<compile_context>
chip_gen: v7x
topology: tpu7x:2x2x1
jax: 0.10.0
libtpu: 0.0.40
codegen_flags: <defaults>
</compile_context>

<pallas_src>
import math
import numpy as np
import jax
import jax.numpy as jnp
from jax.experimental import pallas as pl
from jax.experimental.pallas import tpu as pltpu

_HALF_LOG_2PI = 0.5 * math.log(2.0 * math.pi)


# ----------------------------------------------------------------------------
# VMEM budgeting & tile selection.
# Block legality on TPU: last two dims of a block must be (8, 128)-divisible
# or equal the full array extent.
# ----------------------------------------------------------------------------
def _vmem_limit_bytes():
    cap = 128 << 20
    try:
        info = pltpu.get_tpu_info()
        cap = int(getattr(info, "vmem_capacity_bytes", cap))
    except Exception:
        pass
    # ~32 MiB on v7x (64 MiB physical), 48 MiB on v5e/v6e (128 MiB physical).
    return min(48 << 20, cap // 2)


def _predictive_vmem_bytes(TB, TO, D):
    l2 = 2 * D * TO * D * 2        # bf16 L2, double-buffered
    t = TB * TO * D * 4            # f32 MXU result of the covariance matmul
    x = 2 * TB * D * 4             # f32 x, double-buffered
    wt = 2 * D * TO * 4            # f32 W_mean^T, double-buffered
    outs = 2 * 2 * TB * TO * 4     # mean + scale outputs, double-buffered
    return l2 + t + x + wt + outs


def _pick_predictive_tiles(B, D, O, vmem_budget, tile_b=None, tile_o=None):
    if (tile_b is not None and B % tile_b == 0
            and (tile_b == B or tile_b % 8 == 0)):
        tb_cands = [tile_b]
    else:
        tb_cands = [c for c in (256, 128) if B % c == 0] or [B]

    if (tile_o is not None and O % tile_o == 0
            and (tile_o == O or tile_o % 128 == 0)):
        to_cands = [tile_o]
    else:
        to_cands = [O]
        if O % 128 == 0:
            t = O
            while t > 128 and (t // 2) % 128 == 0:
                t //= 2
                to_cands.append(t)

    # Prefer the biggest batch tile (MXU M-dim fill), then the biggest head tile.
    for tb in tb_cands:
        for to in to_cands:
            if _predictive_vmem_bytes(tb, to, D) <= vmem_budget:
                return tb, to
    # TODO(synk): for very large D the (D, TO*D) block plus the (TB, TO*D) f32
    # intermediate cannot fit VMEM even at TO=128; would need a contraction-axis
    # grid dimension (or the Sigma = L L^T reformulation).
    return tb_cands[-1], to_cands[-1]


def _pick_loss_tile(B, O, loss_tile_b=None, budget=24 << 20):
    if (loss_tile_b is not None and B % loss_tile_b == 0
            and (loss_tile_b == B or loss_tile_b % 8 == 0)):
        return loss_tile_b
    cands = [c for c in (1024, 512, 256, 128) if B % c == 0] or [B]
    for c in cands:
        if 3 * 2 * c * O * 4 <= budget:   # mean/scale/y double-buffered
            return c
    return cands[-1]


# ----------------------------------------------------------------------------
# Kernel 1: predictive distribution hot path (per (head-tile, batch-tile)).
#   mean  = x @ W_mean^T                                (TB, TO)
#   qvar  = per-head quadratic form  x^T Sigma_o x      (TB, TO)
#   scale = sqrt(clip(qvar + noise_var, 1e-12))         (TB, TO)
# ----------------------------------------------------------------------------
def _make_predictive_kernel(TO, D):
    def kernel(x_ref, wt_ref, l2_ref, nvar_ref, mean_ref, scale_ref):
        x = x_ref[...]                                               # (TB, D) f32
        # Small mean matmul: keep f32 (negligible FLOPs, matters for log-probs).
        mean_ref[...] = jnp.dot(x, wt_ref[...],
                                preferred_element_type=jnp.float32)  # (TB, TO)
        # Dominant matmul: bf16 operands on the MXU, f32 accumulation.
        t = jnp.dot(x.astype(jnp.bfloat16), l2_ref[...],
                    preferred_element_type=jnp.float32)              # (TB, TO*D)
        tb = t.shape[0]
        # Vectorized per-head sum of squares: one relayout + one lane reduce
        # (replaces the old Python-unrolled per-head slice/concat loop).
        qvar = jnp.sum(jnp.square(t).reshape(tb, TO, D), axis=-1)    # (TB, TO)
        scale_ref[...] = jnp.sqrt(jnp.maximum(qvar + nvar_ref[...], 1e-12))
    return kernel


# ----------------------------------------------------------------------------
# Kernel 2: Gaussian log-prob partial sums used by the loss closures.
# Per batch tile, emits one lane-padded (8, 128) block holding
#   [0,0] = sum log N(y | mean, noise_scale)
#   [0,1] = sum qvar            (recomputed as scale^2 - noise_var)
#   [0,2] = sum log N(y | mean, pred_scale)
# Final reduction over tiles happens in plain JAX so both v7x TCs can run
# disjoint tiles ("parallel" grid), instead of a single-TC accumulator.
# ----------------------------------------------------------------------------
def _loss_partials_kernel(mean_ref, scale_ref, y_ref, inv_ns_ref, log_ns_ref,
                          nvar_ref, part_ref):
    mean = mean_ref[...]
    scale = scale_ref[...]
    r = y_ref[...] - mean
    c = jnp.float32(_HALF_LOG_2PI)

    # Train-loss likelihood: noise-scale reciprocal & log precomputed host-side.
    z = r * inv_ns_ref[...]
    pred_ll = -0.5 * z * z - log_ns_ref[...] - c

    # Val-loss likelihood (exact divide for accuracy; kernel is HBM-bound).
    zv = r / scale
    val_ll = -0.5 * zv * zv - jnp.log(scale) - c

    # qvar recomputed from scale; differs from the true quadratic form only in
    # the degenerate case where qvar + noise_var hit the 1e-12 sqrt clamp.
    qvar = scale * scale - nvar_ref[...]

    s_pred = jnp.sum(pred_ll)
    s_qvar = jnp.sum(qvar)
    s_val = jnp.sum(val_ll)

    sub = jax.lax.broadcasted_iota(jnp.int32, (8, 128), 0)
    lane = jax.lax.broadcasted_iota(jnp.int32, (8, 128), 1)
    row0 = sub == 0
    part_ref[...] = jnp.where(
        row0 & (lane == 0), s_pred,
        jnp.where(row0 & (lane == 1), s_qvar,
                  jnp.where(row0 & (lane == 2), s_val, jnp.float32(0.0))))


# ----------------------------------------------------------------------------
# Module wrapper (parameter setup / scalar KL terms are plain-JAX glue).
# ----------------------------------------------------------------------------
class VBLLRegressionPallas:
    def __init__(self, in_features, out_features, regularization_weight,
                 prior_scale=1.0, wishart_scale=0.01, dof=1.0,
                 key=jax.random.PRNGKey(0), tile_b=None, tile_o=None,
                 loss_tile_b=None):
        self.D = in_features
        self.O = out_features
        self.regularization_weight = float(regularization_weight)
        self.prior_scale = float(prior_scale)
        self.wishart_scale = float(wishart_scale)
        self.dof = (dof + out_features + 1.0) / 2.0
        self.tile_b = tile_b
        self.tile_o = tile_o
        self.loss_tile_b = loss_tile_b

        k1, k2, k3, k4 = jax.random.split(key, 4)
        self.noise_mean = jnp.zeros((out_features,), jnp.float32)
        self.noise_logdiag = jax.random.normal(k1, (out_features,), jnp.float32) - 1.0
        self.W_mean = jax.random.normal(k2, (out_features, in_features), jnp.float32)
        self.W_logdiag = (jax.random.normal(k3, (out_features, in_features), jnp.float32)
                          - 0.5 * np.log(in_features))
        self.W_offdiag = (jax.random.normal(k4, (out_features, in_features, in_features),
                                            jnp.float32) / in_features)

        # Cholesky factor of W covariance: L[o] = tril(offdiag, -1) + diag(exp(logdiag))
        diag_embed = jax.vmap(jnp.diag)(jnp.exp(self.W_logdiag))           # (O, D, D)
        self.L = jnp.tril(self.W_offdiag, -1) + diag_embed                 # (O, D, D)

        # Precomputed kernel operands.
        self.Wt = self.W_mean.T                                            # (D, O) f32
        L2 = jnp.transpose(self.L, (1, 0, 2)).reshape(self.D, self.O * self.D)
        self.L2_bf16 = L2.astype(jnp.bfloat16)                             # streamed operand
        self.noise_var_2d = jnp.exp(2.0 * self.noise_logdiag)[None, :]     # (1, O)
        self.inv_noise_scale_2d = jnp.exp(-self.noise_logdiag)[None, :]    # (1, O)
        self.log_noise_scale_2d = self.noise_logdiag[None, :]              # (1, O)

    # --- pallas calls -------------------------------------------------------
    def _run_predictive(self, x):
        B = x.shape[0]
        D, O = self.D, self.O
        vmem_limit = _vmem_limit_bytes()
        TB, TO = _pick_predictive_tiles(B, D, O, int(0.9 * vmem_limit),
                                        self.tile_b, self.tile_o)
        no, nb = O // TO, B // TB

        kernel = _make_predictive_kernel(TO, D)
        mean, scale = pl.pallas_call(
            kernel,
            out_shape=[jax.ShapeDtypeStruct((B, O), jnp.float32)] * 2,
            # Head axis OUTER: L2 / Wt block indices depend only on it, so they
            # are DMA'd from HBM exactly once (Pallas skips unchanged blocks).
            grid=(no, nb),
            in_specs=[
                pl.BlockSpec((TB, D), lambda o, b: (b, 0)),        # x (f32)
                pl.BlockSpec((D, TO), lambda o, b: (0, o)),        # W_mean^T (f32)
                pl.BlockSpec((D, TO * D), lambda o, b: (0, o)),    # L2 (bf16)
                pl.BlockSpec((1, TO), lambda o, b: (0, o)),        # noise_var
            ],
            out_specs=[pl.BlockSpec((TB, TO), lambda o, b: (b, o))] * 2,
            compiler_params=pltpu.CompilerParams(
                # Megacore split on heads -> each TC streams a disjoint half of L2.
                dimension_semantics=("parallel", "arbitrary"),
                vmem_limit_bytes=vmem_limit),
        )(x, self.Wt, self.L2_bf16, self.noise_var_2d)
        return mean, scale

    def _run_loss_sums(self, mean, scale, y):
        B, O = mean.shape
        TB = _pick_loss_tile(B, O, self.loss_tile_b)
        nb = B // TB
        parts = pl.pallas_call(
            _loss_partials_kernel,
            out_shape=jax.ShapeDtypeStruct((nb * 8, 128), jnp.float32),
            grid=(nb,),
            in_specs=[
                pl.BlockSpec((TB, O), lambda b: (b, 0)),   # mean
                pl.BlockSpec((TB, O), lambda b: (b, 0)),   # scale
                pl.BlockSpec((TB, O), lambda b: (b, 0)),   # y
                pl.BlockSpec((1, O), lambda b: (0, 0)),    # 1/noise_scale
                pl.BlockSpec((1, O), lambda b: (0, 0)),    # log noise_scale
                pl.BlockSpec((1, O), lambda b: (0, 0)),    # noise_var
            ],
            out_specs=pl.BlockSpec((8, 128), lambda b: (b, 0)),
            compiler_params=pltpu.CompilerParams(
                dimension_semantics=("parallel",)),
        )(mean, scale, y, self.inv_noise_scale_2d, self.log_noise_scale_2d,
          self.noise_var_2d)
        parts = parts.reshape(nb, 8, 128)
        s_pred = jnp.sum(parts[:, 0, 0])
        s_qvar = jnp.sum(parts[:, 0, 1])
        s_val = jnp.sum(parts[:, 0, 2])
        return s_pred, s_qvar, s_val

    # --- forward (mirrors Regression.forward -> VBLLReturn) -----------------
    def forward(self, x):
        mean, scale = self._run_predictive(x)
        pred_mean = mean + self.noise_mean[None, :]   # noise mean is zeros
        pred_scale = scale

        B = x.shape[0]
        n_elem = float(B * self.O)

        trace_prec = jnp.sum(jnp.exp(-2.0 * self.noise_logdiag))
        logdet_prec = -2.0 * jnp.sum(self.noise_logdiag)

        # KL(W || prior) — parameter-only scalar terms (no data-path compute).
        kl = 0.5 * (jnp.sum(self.W_mean ** 2) / self.prior_scale
                    + jnp.sum(self.L ** 2) / self.prior_scale
                    + self.O * self.D * np.log(self.prior_scale)
                    - 2.0 * jnp.sum(self.W_logdiag))
        wishart = self.dof * logdet_prec - 0.5 * self.wishart_scale * trace_prec

        # TODO(synk): y only arrives via these closures (as in the torch module),
        # so the loss reductions run as a separate streaming kernel and cannot be
        # fused into the predictive kernel.
        def train_loss_fn(y):
            s_pred_ll, s_qvar, _ = self._run_loss_sums(pred_mean, pred_scale, y)
            elbo = (s_pred_ll - 0.5 * trace_prec * s_qvar) / n_elem
            elbo = elbo + self.regularization_weight * (wishart - kl)
            return -elbo

        def val_loss_fn(y):
            _, _, s_val_ll = self._run_loss_sums(pred_mean, pred_scale, y)
            return -s_val_ll / n_elem

        return {"predictive": (pred_mean, pred_scale),
                "train_loss_fn": train_loss_fn,
                "val_loss_fn": val_loss_fn}


# ----------------------------------------------------------------------------
# Pure-JAX (f32) reference for verification.
# ----------------------------------------------------------------------------
def _reference(mod, x, y):
    mean = x @ mod.W_mean.T + mod.noise_mean[None, :]
    T = jnp.einsum('bd,odi->boi', x, mod.L)
    qvar = jnp.sum(T ** 2, -1)
    noise_scale = jnp.exp(mod.noise_logdiag)
    noise_var = noise_scale ** 2
    scale = jnp.sqrt(jnp.maximum(qvar + noise_var[None, :], 1e-12))

    def log_prob(yv, mu, sig):
        return -0.5 * ((yv - mu) / sig) ** 2 - jnp.log(sig) - 0.5 * math.log(2 * math.pi)

    pred_ll = log_prob(y, mean, noise_scale[None, :])
    trace_prec = jnp.sum(1.0 / noise_var)
    trace_term = 0.5 * qvar * trace_prec
    kl = 0.5 * (jnp.sum(mod.W_mean ** 2) / mod.prior_scale
                + jnp.sum(mod.L ** 2) / mod.prior_scale
                + mod.O * mod.D * np.log(mod.prior_scale)
                - 2.0 * jnp.sum(mod.W_logdiag))
    wishart = mod.dof * (-2.0 * jnp.sum(mod.noise_logdiag)) - 0.5 * mod.wishart_scale * trace_prec
    elbo = jnp.mean(pred_ll - trace_term) + mod.regularization_weight * (wishart - kl)
    train_loss = -elbo
    val_loss = -jnp.mean(log_prob(y, mean, scale))
    return mean, scale, train_loss, val_loss


def _run_case(B, D_in, D_out, key, tile_b=None, tile_o=None, loss_tile_b=None):
    k_param, k_x, k_y = jax.random.split(key, 3)
    mod = VBLLRegressionPallas(D_in, D_out, regularization_weight=1.0 / B,
                               prior_scale=1.0, wishart_scale=0.01, dof=1.0,
                               key=k_param, tile_b=tile_b, tile_o=tile_o,
                               loss_tile_b=loss_tile_b)
    x = jax.random.normal(k_x, (B, D_in), jnp.float32)
    y = jax.random.normal(k_y, (B, D_out), jnp.float32)

    out = mod.forward(x)
    pred_mean, pred_scale = out["predictive"]
    train_loss = out["train_loss_fn"](y)
    val_loss = out["val_loss_fn"](y)
    jax.block_until_ready((pred_mean, pred_scale, train_loss, val_loss))

    ref_mean, ref_scale, ref_train, ref_val = _reference(mod, x, y)
    np.testing.assert_allclose(np.asarray(pred_mean), np.asarray(ref_mean),
                               rtol=2e-2, atol=2e-2)
    np.testing.assert_allclose(np.asarray(pred_scale), np.asarray(ref_scale),
                               rtol=2e-2, atol=2e-2)
    np.testing.assert_allclose(float(train_loss), float(ref_train),
                               rtol=2e-2, atol=2e-2)
    np.testing.assert_allclose(float(val_loss), float(ref_val),
                               rtol=2e-2, atol=2e-2)


if __name__ == "__main__":
    key = jax.random.PRNGKey(0)
    k_small, k_med = jax.random.split(key, 2)

    # Small case (single full-block grid step everywhere).
    _run_case(B=8, D_in=32, D_out=4, key=k_small)

    # Medium case exercising head-outer / batch-inner tiling (predictive grid
    # (2, 2)) and multi-tile loss partial sums (loss grid (2,)).
    _run_case(B=256, D_in=128, D_out=256, key=k_med,
              tile_b=128, tile_o=128, loss_tile_b=128)

    print("KERNEL_OK")
</pallas_src>

<mosaic_0001>
module attributes {stable_mosaic.version = 11 : i64} {
  func.func @kernel(%arg0: i32, %arg1: i32, %arg2: memref<8x32xf32, #tpu.memory_space<vmem>>, %arg3: memref<32x4xf32, #tpu.memory_space<vmem>>, %arg4: memref<32x128xbf16, #tpu.memory_space<vmem>>, %arg5: memref<1x4xf32, #tpu.memory_space<vmem>>, %arg6: memref<8x4xf32, #tpu.memory_space<vmem>>, %arg7: memref<8x4xf32, #tpu.memory_space<vmem>>) attributes {dimension_semantics = [#tpu.dimension_semantics<parallel>, #tpu.dimension_semantics<arbitrary>], iteration_bounds = array<i64: 1, 1>, scalar_prefetch = 0 : i64, scratch_operands = 0 : i64, tpu.core_type = #tpu.core_type<tc>, window_params = [{transform_indices = @transform_0, window_bounds = array<i64: 8, 32>}, {transform_indices = @transform_1, window_bounds = array<i64: 32, 4>}, {transform_indices = @transform_2, window_bounds = array<i64: 32, 128>}, {transform_indices = @transform_3, window_bounds = array<i64: 1, 4>}, {transform_indices = @transform_4, window_bounds = array<i64: 8, 4>}, {transform_indices = @transform_5, window_bounds = array<i64: 8, 4>}]} {
    %c0 = arith.constant 0 : index
    %c0_0 = arith.constant 0 : index
    %0 = vector.load %arg2[%c0, %c0_0] : memref<8x32xf32, #tpu.memory_space<vmem>>, vector<8x32xf32>
    %c0_1 = arith.constant 0 : index
    %c0_2 = arith.constant 0 : index
    %1 = vector.load %arg3[%c0_1, %c0_2] : memref<32x4xf32, #tpu.memory_space<vmem>>, vector<32x4xf32>
    %cst = arith.constant dense<0.000000e+00> : vector<8x4xf32>
    %2 = tpu.matmul %0, %1, %cst {dimension_numbers = #tpu.dot_dimension_numbers<[1], [0], [0], [1], [0, 0, 1, 1], [], []>} : vector<8x32xf32>, vector<32x4xf32>, vector<8x4xf32> -> vector<8x4xf32>
    %c0_3 = arith.constant 0 : index
    %c0_4 = arith.constant 0 : index
    %3 = vector.load %arg6[%c0_3, %c0_4] : memref<8x4xf32, #tpu.memory_space<vmem>>, vector<8x4xf32>
    tpu.vector_store %arg6[%c0_3, %c0_4], %2 {strides = array<i32>} : memref<8x4xf32, #tpu.memory_space<vmem>>, vector<8x4xf32>,
    %4 = arith.truncf %0 : vector<8x32xf32> to vector<8x32xbf16>
    %c0_5 = arith.constant 0 : index
    %c0_6 = arith.constant 0 : index
    %5 = vector.load %arg4[%c0_5, %c0_6] : memref<32x128xbf16, #tpu.memory_space<vmem>>, vector<32x128xbf16>
    %cst_7 = arith.constant dense<0.000000e+00> : vector<8x128xf32>
    %6 = tpu.matmul %4, %5, %cst_7 {dimension_numbers = #tpu.dot_dimension_numbers<[1], [0], [0], [1], [0, 0, 1, 1], [], []>} : vector<8x32xbf16>, vector<32x128xbf16>, vector<8x128xf32> -> vector<8x128xf32>
    %7 = arith.mulf %6, %6 : vector<8x128xf32>
    %8 = vector.shape_cast %7 : vector<8x128xf32> to vector<8x4x32xf32>
    %cst_8 = arith.constant dense<0.000000e+00> : vector<8x4xf32>
    %9 = vector.multi_reduction <add>, %8, %cst_8 [2] : vector<8x4x32xf32> to vector<8x4xf32>
    %c0_9 = arith.constant 0 : index
    %c0_10 = arith.constant 0 : index
    %10 = vector.load %arg5[%c0_9, %c0_10] : memref<1x4xf32, #tpu.memory_space<vmem>>, vector<1x4xf32>
    %11 = vector.broadcast %10 : vector<1x4xf32> to vector<8x4xf32>
    %12 = arith.addf %9, %11 : vector<8x4xf32>
    %cst_11 = arith.constant 9.99999996E-13 : f32
    %13 = vector.broadcast %cst_11 : f32 to vector<8x4xf32>
    %14 = arith.maximumf %12, %13 : vector<8x4xf32>
    %15 = math.sqrt %14 : vector<8x4xf32>
    %c0_12 = arith.constant 0 : index
    %c0_13 = arith.constant 0 : index
    %16 = vector.load %arg7[%c0_12, %c0_13] : memref<8x4xf32, #tpu.memory_space<vmem>>, vector<8x4xf32>
    tpu.vector_store %arg7[%c0_12, %c0_13], %15 {strides = array<i32>} : memref<8x4xf32, #tpu.memory_space<vmem>>, vector<8x4xf32>,
    return
  }
  func.func @transform_0(%arg0: i32, %arg1: i32) -> (i32, i32) {
    %c0_i32 = arith.constant 0 : i32
    %c0_i32_0 = arith.constant 0 : i32
    return %arg1, %c0_i32 : i32, i32
  }
  func.func @transform_1(%arg0: i32, %arg1: i32) -> (i32, i32) {
    %c0_i32 = arith.constant 0 : i32
    %c0_i32_0 = arith.constant 0 : i32
    return %c0_i32, %arg0 : i32, i32
  }
  func.func @transform_2(%arg0: i32, %arg1: i32) -> (i32, i32) {
    %c0_i32 = arith.constant 0 : i32
    %c0_i32_0 = arith.constant 0 : i32
    return %c0_i32, %arg0 : i32, i32
  }
  func.func @transform_3(%arg0: i32, %arg1: i32) -> (i32, i32) {
    %c0_i32 = arith.constant 0 : i32
    %c0_i32_0 = arith.constant 0 : i32
    return %c0_i32, %arg0 : i32, i32
  }
  func.func @transform_4(%arg0: i32, %arg1: i32) -> (i32, i32) {
    %c0_i32 = arith.constant 0 : i32
    return %arg1, %arg0 : i32, i32
  }
  func.func @transform_5(%arg0: i32, %arg1: i32) -> (i32, i32) {
    %c0_i32 = arith.constant 0 : i32
    return %arg1, %arg0 : i32, i32
  }
}

</mosaic_0001>

<bundles_post_ra>
// kernel: tpu_custom_call.1
= control target key start
LH: loop header
LB: loop body
LE: loop exit
PB: predicated region body
PF: predicated region fallthrough
CT: control target
= control target key end

     0   :  { %v504_v0 = vmov 0.0   ;;  %vm505_vm0 = vmmov 0   ;;  %vm25_vm1 = vcmask 261120   ;;  %v177_v5 = vlaneseq  ;;  %s507_s24 = smov 96   ;;  %s619_s2 = inlined_call_operand.vmem [shape: bf16[32,128], index: 2, kind: input, shape index: {}]   ;;  %s620_s0 = inlined_call_operand.vmem [shape: f32[8,32], index: 0, kind: input, shape index: {}]   ;;  %s621_s1 = inlined_call_operand.vmem [shape: f32[32,4], index: 1, kind: input, shape index: {}]   ;;  %s622_s3 = inlined_call_operand.vmem [shape: f32[1,4], index: 3, kind: input, shape index: {}]   ;;  %s623_s4 = inlined_call_operand.vmem [shape: f32[8,4], index: 4, kind: output, shape index: {0}]   ;;  %s624_s5 = inlined_call_operand.vmem [shape: f32[8,4], index: 5, kind: output, shape index: {1}]  }
   0x1   :  { %461 = vmatprep.subr.bf16.mxu1 %v504_v0  ;;  %v486_v1 = vld [vmem:[%s619_s2] sm:$0xff]   ;;  %465 = vmatprep.mubr.msk.bf16.mxu1 %vm505_vm0, %v504_v0  ;;  %v487_v2 = vld [vmem:[%s619_s2 + $0x8] sm:$0xff]   ;;  %s506_s2 = smov 32   ;;  %v509_v14 = vmov 0.0|0.0   ;;  %v23_v17 = vld [vmem:[%s621_s1 + $0x10] sm:$0xff]  ;;  %vm240_vm2 = vcmask 257024  }
   0x2   :  { %458 = vmatprep.mubr.msk.f32.mxu0 %vm505_vm0, %v504_v0  ;;  %462 = vmatpush3.bf16.msra.mxu1 %v486_v1  ;;  %v20_v3 = vld [vmem:[%s620_s0] sm:$0xff]  ;;  %v178_v6 = vshrl.u32 %v177_v5, 7  ;;  %v380_v7 = vand.u32 127, %v177_v5  ;;  %s508_s0 = smov 64   ;;  %v22_v16 = vld [vmem:[%s621_s1 + $0x8] sm:$0xff]  ;;  %v24_v19 = vld [vmem:[%s621_s1 + $0x18] sm:$0xff] }
   0x3   :  { %463 = vmatprep.subr.bf16.mxu1 %v504_v0  ;;  %v101_v4 = vpack.c.bf16 %v20_v3, %v20_v3  ;;  %469 = vmatprep.subr.bf16.mxu0 %v509_v14  ;;  %v21_v15 = vld [vmem:[%s621_s1] sm:$0xff]  ;;  %v473_v20 = vpack.c.bf16 %v24_v19, %v23_v17  ;;  %v510_v21 = vmov 1983009808   ;;  %v511_v23 = vmov 1934713408  }
   0x4   :  { %v557_v8 = vsub.s32 %v380_v7, %v178_v6  ;;  %v470_v18 = vpack.c.bf16 %v22_v16, %v21_v15  ;;  %v175_v22 = vunpack.c.l.s4 %v510_v21  ;;  %v207_v24 = vunpack.c.l.s4 %v511_v23  ;;  %v441_v60 = vld [vmem:[%s622_s3] ss:$0 sm:$0xff] }
   0x5   :  { %v512_v61 = vmov 0  }
   0x6   :  { %464 = vmatpush3.bf16.msra.mxu1 %v487_v2  ;;  %471 = vmatpush3.bf16.msra.mxu0 %v470_v18  ;;  %v176_v25 = vunpack.c.0.s8 %v175_v22  ;;  %v208_v28 = vunpack.c.0.s8 %v207_v24 }
   0x7   :  { %472 = vmatprep.subr.bf16.mxu0 %v509_v14  ;;  %485 = vset.pattern.permute.xlu0 %v512_v61 }
   0x8   :  { %v179_v29 = vsub.s32 %v176_v25, %v178_v6  ;;  %v211_v35 = vsub.s32 %v208_v28, %v178_v6  ;;  %484 = vset.pattern.permute.xlu1 %v512_v61 }
   0x9   :  { %466 = vmatmul.mubr.msk.bf16.vlgmr.msra.gmra.mrb[0].mxu1 %vm25_vm1, %v101_v4 }
   0xa   :  { %474 = vmatpush3.bf16.msra.mxu0 %v473_v20 }
   0xd   :  { %459 = vmatmul.mubr.msk.f32.vlgmr.msra.gmra.mrb[0].mxu0 %vm25_vm1, %v20_v3 }
  0xdc   :  { %v155_v9 = vpop.f32.mrb[0].mxu1 }
  0xdd   :  { %v161_v10 = vmul.f32 %v155_v9, %v155_v9  ;;  %v467_v11 = vpop.f32.mrb[1].mxu1 }
  0xde   :  { %v158_v12 = vpop.f32.mrb[2].mxu1 }
  0xdf   :  { %169 = vrot.lane.b32.xlu1 %v161_v10, %s506_s2  ;;  %163 = vrot.lane.b32.xlu0 %v161_v10, %s507_s24  ;;  %v468_v13 = vpop.f32.mrb[3].mxu1 }
  0xe3   :  { %166 = vrot.lane.b32.xlu0 %v161_v10, %s508_s0 }
 0x151   :  { %v170_v26 = vpop.permute.xlu1 %169  ;;  %v164_v27 = vpop.permute.xlu0 %163 }
 0x152   :  { %v188_v30 = vcombine.low %v164_v27, %v170_v26  ;;  %v189_v31 = vcombine.high %v164_v27, %v170_v26 }
 0x154   :  { %v196_v36 = vrot.slane %v188_v30, %v179_v29  ;;  %v203_v37 = vrot.slane %v189_v31, %v179_v29 }
 0x155   :  { %v167_v32 = vpop.permute.xlu0 %166 }
 0x156   :  { %v172_v33 = vcombine.low %v161_v10, %v167_v32  ;;  %v173_v34 = vcombine.high %v161_v10, %v167_v32 }
 0x158   :  { %v180_v38 = vrot.slane %v172_v33, %v179_v29  ;;  %v187_v39 = vrot.slane %v173_v34, %v179_v29 }
 0x15a   :  { %v205_v40 = vcombine.high %v180_v38, %v196_v36  ;;  %v204_v41 = vcombine.low %v180_v38, %v196_v36  ;;  %v220_v42 = vcombine.low %v187_v39, %v203_v37  ;;  %v221_v45 = vcombine.high %v187_v39, %v203_v37 }
 0x15c   :  { %v219_v43 = vrot.slane %v205_v40, %v211_v35  ;;  %v212_v44 = vrot.slane %v204_v41, %v211_v35  ;;  %v228_v48 = vrot.slane %v220_v42, %v211_v35  ;;  %v235_v52 = vrot.slane %v221_v45, %v211_v35 }
 0x15e   :  { %v247_v46 = vsel %vm240_vm2, %v219_v43, 0.0  ;;  %v241_v47 = vsel %vm240_vm2, %v212_v44, 0.0  ;;  %v237_v49 = vcombine.high %v219_v43, %v504_v0  ;;  %v253_v50 = vsel %vm240_vm2, %v228_v48, 0.0 }
 0x15f   :  { %248 = vadd.xlane.f32.xlu0 %v247_v46  ;;  %242 = vadd.xlane.f32.xlu1 %v241_v47  ;;  %v238_v53 = vcombine.high %v228_v48, %v504_v0  ;;  %v259_v54 = vsel %vm240_vm2, %v235_v52, 0.0  ;;  %v239_v56 = vcombine.high %v235_v52, %v504_v0  ;;  %v236_v57 = vcombine.high %v212_v44, %v504_v0 }
 0x160   :  { %v250_v51 = vsel %vm240_vm2, %v237_v49, 0.0 }
 0x161   :  { %v256_v55 = vsel %vm240_vm2, %v238_v53, 0.0  ;;  %v262_v58 = vsel %vm240_vm2, %v239_v56, 0.0  ;;  %v244_v59 = vsel %vm240_vm2, %v236_v57, 0.0 }
 0x163   :  { %254 = vadd.xlane.f32.xlu0 %v253_v50  ;;  %251 = vadd.xlane.f32.xlu1 %v250_v51 }
 0x167   :  { %260 = vadd.xlane.f32.xlu0 %v259_v54  ;;  %257 = vadd.xlane.f32.xlu1 %v256_v55 }
 0x16b   :  { %263 = vadd.xlane.f32.xlu1 %v262_v58  ;;  %245 = vadd.xlane.f32.xlu0 %v244_v59 }
 0x181   :  { %272 = vbcast.lane.b32.xlu0 %v441_v60, 256 }
 0x1ec   :  { %v249_v62 = vpop.xlane.xlu0 %248  ;;  %v243_v63 = vpop.xlane.xlu1 %242 }
 0x1f0   :  { %v255_v1 = vpop.xlane.xlu0 %254  ;;  %v252_v0 = vpop.xlane.xlu1 %251 }
 0x1f4   :  { %v261_v2 = vpop.xlane.xlu0 %260  ;;  %v258_v3 = vpop.xlane.xlu1 %257 }
 0x1f8   :  { %v246_v4 = vpop.xlane.xlu0 %245  ;;  %v264_v6 = vpop.xlane.xlu1 %263 }
 0x1fc   :  { %v273_v5 = vpop.permute.xlu0 %272 }
 0x1fd   :  { %v275_v7 = vadd.f32 %v273_v5, %v243_v63  ;;  %v277_v9 = vadd.f32 %v273_v5, %v249_v62  ;;  %v276_v10 = vadd.f32 %v273_v5, %v246_v4  ;;  %v279_v11 = vadd.f32 %v273_v5, %v255_v1  ;;  %v95_v1 = vpop.f32.mrb[0].mxu0 }
 0x1fe   :  { %v280_v12 = vadd.f32 %v273_v5, %v258_v3  ;;  %v282_v13 = vadd.f32 %v273_v5, %v264_v6  ;;  %v278_v16 = vadd.f32 %v273_v5, %v252_v0  ;;  %v281_v21 = vadd.f32 %v273_v5, %v261_v2  ;;  %v460_v0 = vpop.f32.mrb[1].mxu0 }
 0x1ff   :  { %v283_v14 = vmax.f32 %v275_v7, 1e-12  ;;  %v285_v15 = vmax.f32 %v277_v9, 1e-12  ;;  %v287_v17 = vmax.f32 %v279_v11, 1e-12 }
 0x200   :  { %v288_v18 = vmax.f32 %v280_v12, 1e-12  ;;  %v290_v19 = vmax.f32 %v282_v13, 1e-12  ;;  %v284_v20 = vmax.f32 %v276_v10, 1e-12 }
 0x201   :  { %488 = vrsqrt.f32 %v285_v15  ;;  %v587_v22 = vmax.f32 %v278_v16, 1e-12  ;;  %v589_v23 = vmax.f32 %v281_v21, 1e-12  ;;  %vm307_vm3 = vcmp.eq.f32.partialorder %v285_v15, inf }
 0x202   :  { %490 = vrsqrt.f32 %v283_v14  ;;  %vm309_vm4 = vcmp.eq.f32.partialorder %v285_v15, 0.0  ;;  %v310_v28 = vand.u32 2147483648, %v285_v15  ;;  %vm293_vm5 = vcmp.eq.f32.partialorder %v283_v14, inf }
 0x203   :  { %492 = vrsqrt.f32 %v288_v18  ;;  %vm295_vm6 = vcmp.eq.f32.partialorder %v283_v14, 0.0  ;;  %v296_v32 = vand.u32 2147483648, %v283_v14  ;;  %vm328_vm7 = vcmp.eq.f32.partialorder %v288_v18, inf }
 0x204   :  { %494 = vrsqrt.f32 %v287_v17  ;;  %vm321_vm8 = vcmp.eq.f32.partialorder %v287_v17, inf  ;;  %v331_v42 = vand.u32 2147483648, %v288_v18  ;;  %vm330_vm9 = vcmp.eq.f32.partialorder %v288_v18, 0.0 }
 0x205   :  { %496 = vrsqrt.f32 %v290_v19  ;;  %v324_v46 = vand.u32 2147483648, %v287_v17  ;;  %vm323_vm10 = vcmp.eq.f32.partialorder %v287_v17, 0.0  ;;  %vm342_vm11 = vcmp.eq.f32.partialorder %v290_v19, inf }
 0x206   :  { %498 = vrsqrt.f32 %v284_v20  ;;  %vm300_vm12 = vcmp.eq.f32.partialorder %v284_v20, inf  ;;  %v345_v50 = vand.u32 2147483648, %v290_v19  ;;  %vm344_vm13 = vcmp.eq.f32.partialorder %v290_v19, 0.0 }
 0x207   :  { %500 = vrsqrt.f32 %v587_v22  ;;  %v303_v54 = vand.u32 2147483648, %v284_v20  ;;  %vm302_vm14 = vcmp.eq.f32.partialorder %v284_v20, 0.0  ;;  %vm314_vm15 = vcmp.eq.f32.partialorder %v587_v22, inf }
 0x208   :  { %502 = vrsqrt.f32 %v589_v23  ;;  %v317_v59 = vand.u32 2147483648, %v587_v22  ;;  %vm316_vm0 = vcmp.eq.f32.partialorder %v587_v22, 0.0  ;;  %vm335_vm1 = vcmp.eq.f32.partialorder %v589_v23, inf }
 0x209   :  { %v338_v62 = vand.u32 2147483648, %v589_v23  ;;  %vm337_vm2 = vcmp.eq.f32.partialorder %v589_v23, 0.0 }
 0x20b   :  { %v489_v24 = vpop.eup %488 }
 0x20c   :  { %v491_v25 = vpop.eup %490  ;;  %v306_v26 = vmul.f32 %v489_v24, %v285_v15 }
 0x20d   :  { %v493_v27 = vpop.eup %492  ;;  %v292_v29 = vmul.f32 %v491_v25, %v283_v14 }
 0x20e   :  { %v495_v30 = vpop.eup %494  ;;  %v308_v31 = vsel %vm307_vm3, %v285_v15, %v306_v26  ;;  %v327_v33 = vmul.f32 %v493_v27, %v288_v18  ;;  %vm99_vm3 = vcmask 31744  }
 0x20f   :  { %v497_v34 = vpop.eup %496  ;;  %v311_v35 = vsel %vm309_vm4, %v310_v28, %v308_v31  ;;  %v294_v36 = vsel %vm293_vm5, %v283_v14, %v292_v29  ;;  %v320_v37 = vmul.f32 %v495_v30, %v287_v17  ;;  %100 = vst.msk [vmem:[%s623_s4] sm:$0xff] %vm99_vm3, %v95_v1  ;;  %vm413_vm4 = vcmask 1041409  }
 0x210   :  { %v499_v38 = vpop.eup %498  ;;  %362 = vperm.xlu0 %485, %v311_v35   ;;  %v297_v39 = vsel %vm295_vm6, %v296_v32, %v294_v36  ;;  %v329_v40 = vsel %vm328_vm7, %v288_v18, %v327_v33  ;;  %v341_v41 = vmul.f32 %v497_v34, %v290_v19  ;;  %vm415_vm5 = vcmask 1042434  }
 0x211   :  { %356 = vperm.xlu1 %484, %v297_v39   ;;  %v322_v43 = vsel %vm321_vm8, %v287_v17, %v320_v37  ;;  %v299_v44 = vmul.f32 %v499_v38, %v284_v20  ;;  %v501_v45 = vpop.eup %500  ;;  %v332_v47 = vsel %vm330_vm9, %v331_v42, %v329_v40  ;;  %vm417_vm6 = vcmask 1043459  }
 0x212   :  { %v325_v48 = vsel %vm323_vm10, %v324_v46, %v322_v43  ;;  %v343_v49 = vsel %vm342_vm11, %v290_v19, %v341_v41  ;;  %v313_v52 = vmul.f32 %v501_v45, %v587_v22  ;;  %v503_v53 = vpop.eup %502  ;;  %vm419_vm7 = vcmask 1044484  }
 0x213   :  { %v301_v51 = vsel %vm300_vm12, %v284_v20, %v299_v44  ;;  %v346_v55 = vsel %vm344_vm13, %v345_v50, %v343_v49  ;;  %v334_v58 = vmul.f32 %v503_v53, %v589_v23  ;;  %vm421_vm8 = vcmask 1045509  }
 0x214   :  { %371 = vperm.xlu0 %485, %v332_v47   ;;  %v304_v56 = vsel %vm302_vm14, %v303_v54, %v301_v51  ;;  %v315_v57 = vsel %vm314_vm15, %v587_v22, %v313_v52  ;;  %vm423_vm9 = vcmask 1046534   ;;  %vm425_vm10 = vcmask 1047559  }
 0x215   :  { %368 = vperm.xlu1 %484, %v325_v48   ;;  %v318_v60 = vsel %vm316_vm0, %v317_v59, %v315_v57  ;;  %v336_v61 = vsel %vm335_vm1, %v589_v23, %v334_v58 }
 0x216   :  { %v339_v63 = vsel %vm337_vm2, %v338_v62, %v336_v61 }
 0x218   :  { %377 = vperm.xlu0 %485, %v346_v55  }
 0x219   :  { %359 = vperm.xlu1 %484, %v304_v56  }
 0x21d   :  { %365 = vperm.xlu1 %484, %v318_v60  }
 0x221   :  { %374 = vperm.xlu1 %484, %v339_v63  }
 0x28f   :  { %v363_v3 = vpop.permute.xlu0 %362 }
 0x290   :  { %v357_v2 = vpop.permute.xlu1 %356  ;;  %v392_v11 = vrot.slane %v363_v3, %v557_v8 }
 0x291   :  { %v384_v6 = vrot.slane %v357_v2, %v557_v8 }
 0x293   :  { %v372_v7 = vpop.permute.xlu0 %371 }
 0x294   :  { %v369_v4 = vpop.permute.xlu1 %368  ;;  %v404_v16 = vrot.slane %v372_v7, %v557_v8 }
 0x295   :  { %v400_v14 = vrot.slane %v369_v4, %v557_v8 }
 0x297   :  { %v378_v17 = vpop.permute.xlu0 %377 }
 0x298   :  { %v360_v5 = vpop.permute.xlu1 %359  ;;  %v412_v23 = vrot.slane %v378_v17, %v557_v8 }
 0x299   :  { %v388_v9 = vrot.slane %v360_v5, %v557_v8 }
 0x29b   :  { %v414_v10 = vsel %vm413_vm4, %v388_v9, %v384_v6 }
 0x29c   :  { %v366_v12 = vpop.permute.xlu1 %365  ;;  %v416_v15 = vsel %vm415_vm5, %v392_v11, %v414_v10 }
 0x29d   :  { %v396_v13 = vrot.slane %v366_v12, %v557_v8 }
 0x29f   :  { %v418_v18 = vsel %vm417_vm6, %v396_v13, %v416_v15 }
 0x2a0   :  { %v420_v19 = vsel %vm419_vm7, %v400_v14, %v418_v18  ;;  %v375_v20 = vpop.permute.xlu1 %374 }
 0x2a1   :  { %v422_v21 = vsel %vm421_vm8, %v404_v16, %v420_v19  ;;  %v408_v22 = vrot.slane %v375_v20, %v557_v8 }
 0x2a3   :  { %v424_v24 = vsel %vm423_vm9, %v408_v22, %v422_v21 }
 0x2a4   :  { %v426_v25 = vsel %vm425_vm10, %v412_v23, %v424_v24 }
 0x2a5   :  { %428 = vst.msk [vmem:[%s624_s5] sm:$0xff] %vm99_vm3, %v426_v25 }

</bundles_post_ra>
